<compile_context>
chip_gen: v6e
topology: v6e:2x2x1
jax: 0.10.0
libtpu: 0.0.40
codegen_flags: <defaults>
</compile_context>

<pallas_src>
import numpy as np
import jax
import jax.numpy as jnp
from jax.experimental import pallas as pl
from jax.experimental.pallas import tpu as pltpu

# ----------------------------------------------------------------------------
# Static layer / packing layout
# ----------------------------------------------------------------------------

LAYER_DIMS = [(100, 300), (300, 200), (200, 100), (100, 50), (50, 1)]  # (in, out)
PAD_IN     = [128, 384, 256, 128, 128]   # padded contraction dims
PAD_OUT    = [384, 256, 128, 128, 128]   # padded output dims
NUM_LAYERS = len(LAYER_DIMS)

DIN_PAD   = PAD_IN[0]     # 128 (padded input features)
DOUT_PAD  = PAD_OUT[-1]   # 128 (padded output features, only col 0 is real)
MAX_WIDTH = max(PAD_OUT)  # 384 (lane width of the packed parameter buffer)
BIAS_ROWS = 16            # bf16 sublane tile -> keep every segment 16-row aligned

_layout = []
_row = 0
for _pi, _po in zip(PAD_IN, PAD_OUT):
    _w_off = _row; _row += _pi
    _b_off = _row; _row += BIAS_ROWS
    _layout.append((_w_off, _b_off, _pi, _po))
LAYOUT = tuple(_layout)          # (w_row_off, b_row_off, padded_in, padded_out)
TOTAL_ROWS = _row                # 1104 rows x 384 lanes of bf16 (~0.8 MiB)


def _round_up(n, m):
    return ((n + m - 1) // m) * m


# ----------------------------------------------------------------------------
# Kernel: fully fused 5-layer MLP, params resident in VMEM
# ----------------------------------------------------------------------------

def policy_net_kernel(x_ref, p_ref, o_ref):
    h = x_ref[...]  # (TB, 128) f32, pad lanes are zero

    for li, (w_off, b_off, pi, po) in enumerate(LAYOUT):
        w = p_ref[pl.ds(w_off, pi), pl.ds(0, po)]                       # bf16 (pi, po)
        b = p_ref[pl.ds(b_off, 1), pl.ds(0, po)].astype(jnp.float32)    # f32  (1,  po)
        h = jnp.dot(h.astype(jnp.bfloat16), w,
                    preferred_element_type=jnp.float32) + b
        if li < NUM_LAYERS - 1:
            h = jnp.maximum(h, 0.0)   # ReLU (pad lanes stay 0)
        else:
            h = jnp.tanh(h)           # Tanh (tanh(0)=0 on pad lanes)

    o_ref[...] = h                    # (TB, 128) lane-dense, unmasked store


# ----------------------------------------------------------------------------
# Wrapper
# ----------------------------------------------------------------------------

def policy_net_forward(x, packed_params):
    """x: (B, 100) float32. packed_params: (TOTAL_ROWS, MAX_WIDTH) bfloat16."""
    B, F = x.shape
    assert F == LAYER_DIMS[0][0]

    TB = min(512, _round_up(B, 8))          # batch tile (rows), multiple of 8
    B_pad = _round_up(B, TB)
    grid = (pl.cdiv(B_pad, TB),)

    # Pad batch to TB multiple and features to 128 lanes (zeros).
    x_pad = jnp.zeros((B_pad, DIN_PAD), jnp.float32).at[:B, :F].set(x)

    out = pl.pallas_call(
        policy_net_kernel,
        out_shape=jax.ShapeDtypeStruct((B_pad, DOUT_PAD), jnp.float32),
        grid=grid,
        in_specs=[
            pl.BlockSpec((TB, DIN_PAD), lambda i: (i, 0)),        # x tile per step
            pl.BlockSpec(packed_params.shape, lambda i: (0, 0)),  # params pinned
        ],
        out_specs=pl.BlockSpec((TB, DOUT_PAD), lambda i: (i, 0)),
        compiler_params=pltpu.CompilerParams(
            dimension_semantics=("parallel",),   # megacore sharding on v7x
            vmem_limit_bytes=32 << 20,
        ),
    )(x_pad, packed_params)

    return out[:B, :1]


# ----------------------------------------------------------------------------
# Parameter init (PyTorch nn.Linear-style uniform bounds) and packing
# ----------------------------------------------------------------------------

def init_params(key):
    params = []
    for fan_in, fan_out in LAYER_DIMS:
        key, kw, kb = jax.random.split(key, 3)
        bound = 1.0 / np.sqrt(fan_in)
        # stored as (in, out) so kernel does x @ W (== PyTorch x @ W.T + b)
        w = jax.random.uniform(kw, (fan_in, fan_out), jnp.float32, -bound, bound)
        b = jax.random.uniform(kb, (fan_out,), jnp.float32, -bound, bound)
        params.append((w, b))
    return params


def pack_params(params):
    """Pack all weights/biases into one tile-aligned bf16 buffer; pads are zero."""
    buf = np.zeros((TOTAL_ROWS, MAX_WIDTH), np.float32)
    for (w, b), (w_off, b_off, _pi, _po), (fi, fo) in zip(params, LAYOUT, LAYER_DIMS):
        buf[w_off:w_off + fi, :fo] = np.asarray(w)
        buf[b_off, :fo] = np.asarray(b)
    return jnp.asarray(buf).astype(jnp.bfloat16)


def reference_forward(x, params):
    """Pure-JAX reference using the same bf16-rounded weights the kernel sees."""
    h = x
    for i, (w, b) in enumerate(params):
        w = w.astype(jnp.bfloat16).astype(jnp.float32)
        b = b.astype(jnp.bfloat16).astype(jnp.float32)
        h = h @ w + b
        h = jnp.maximum(h, 0.0) if i < len(params) - 1 else jnp.tanh(h)
    return h


if __name__ == "__main__":
    key = jax.random.PRNGKey(0)
    kx, kp = jax.random.split(key)

    B = 8
    x = jax.random.normal(kx, (B, 100), jnp.float32)
    params = init_params(kp)
    packed = pack_params(params)

    out = policy_net_forward(x, packed)
    out = jax.block_until_ready(out)

    ref = reference_forward(x, params)
    assert out.shape == (B, 1)
    # bf16 weights + bf16 activation casts inside the MXU path -> relaxed tol.
    assert jnp.allclose(out, ref, atol=2e-2, rtol=2e-2), "mismatch vs reference"

    print("KERNEL_OK")
</pallas_src>

<mosaic_0001>
module attributes {stable_mosaic.version = 11 : i64} {
  func.func @policy_net_kernel(%arg0: i32, %arg1: memref<8x128xf32, #tpu.memory_space<vmem>>, %arg2: memref<1104x384xbf16, #tpu.memory_space<vmem>>, %arg3: memref<8x128xf32, #tpu.memory_space<vmem>>) attributes {dimension_semantics = [#tpu.dimension_semantics<parallel>], iteration_bounds = array<i64: 1>, scalar_prefetch = 0 : i64, scratch_operands = 0 : i64, tpu.core_type = #tpu.core_type<tc>, window_params = [{transform_indices = @transform_0, window_bounds = array<i64: 8, 128>}, {pipeline_mode = #tpu.pipeline_mode<synchronous>, transform_indices = @transform_1, window_bounds = array<i64: 1104, 384>}, {transform_indices = @transform_2, window_bounds = array<i64: 8, 128>}]} {
    %c0 = arith.constant 0 : index
    %c0_0 = arith.constant 0 : index
    %0 = vector.load %arg1[%c0, %c0_0] : memref<8x128xf32, #tpu.memory_space<vmem>>, vector<8x128xf32>
    %c0_1 = arith.constant 0 : index
    %c0_2 = arith.constant 0 : index
    %1 = vector.load %arg2[%c0_1, %c0_2] : memref<1104x384xbf16, #tpu.memory_space<vmem>>, vector<128x384xbf16>
    %c128 = arith.constant 128 : index
    %c0_3 = arith.constant 0 : index
    %2 = vector.load %arg2[%c128, %c0_3] : memref<1104x384xbf16, #tpu.memory_space<vmem>>, vector<1x384xbf16>
    %3 = arith.extf %2 : vector<1x384xbf16> to vector<1x384xf32>
    %4 = arith.truncf %0 : vector<8x128xf32> to vector<8x128xbf16>
    %cst = arith.constant dense<0.000000e+00> : vector<8x384xf32>
    %5 = tpu.matmul %4, %1, %cst {dimension_numbers = #tpu.dot_dimension_numbers<[1], [0], [0], [1], [0, 0, 1, 1], [], []>} : vector<8x128xbf16>, vector<128x384xbf16>, vector<8x384xf32> -> vector<8x384xf32>
    %6 = vector.broadcast %3 : vector<1x384xf32> to vector<8x384xf32>
    %7 = arith.addf %5, %6 : vector<8x384xf32>
    %cst_4 = arith.constant 0.000000e+00 : f32
    %8 = vector.broadcast %cst_4 : f32 to vector<8x384xf32>
    %9 = arith.maximumf %7, %8 : vector<8x384xf32>
    %c144 = arith.constant 144 : index
    %c0_5 = arith.constant 0 : index
    %10 = vector.load %arg2[%c144, %c0_5] : memref<1104x384xbf16, #tpu.memory_space<vmem>>, vector<384x256xbf16>
    %c528 = arith.constant 528 : index
    %c0_6 = arith.constant 0 : index
    %11 = vector.load %arg2[%c528, %c0_6] : memref<1104x384xbf16, #tpu.memory_space<vmem>>, vector<1x256xbf16>
    %12 = arith.extf %11 : vector<1x256xbf16> to vector<1x256xf32>
    %13 = arith.truncf %9 : vector<8x384xf32> to vector<8x384xbf16>
    %cst_7 = arith.constant dense<0.000000e+00> : vector<8x256xf32>
    %14 = tpu.matmul %13, %10, %cst_7 {dimension_numbers = #tpu.dot_dimension_numbers<[1], [0], [0], [1], [0, 0, 1, 1], [], []>} : vector<8x384xbf16>, vector<384x256xbf16>, vector<8x256xf32> -> vector<8x256xf32>
    %15 = vector.broadcast %12 : vector<1x256xf32> to vector<8x256xf32>
    %16 = arith.addf %14, %15 : vector<8x256xf32>
    %cst_8 = arith.constant 0.000000e+00 : f32
    %17 = vector.broadcast %cst_8 : f32 to vector<8x256xf32>
    %18 = arith.maximumf %16, %17 : vector<8x256xf32>
    %c544 = arith.constant 544 : index
    %c0_9 = arith.constant 0 : index
    %19 = vector.load %arg2[%c544, %c0_9] : memref<1104x384xbf16, #tpu.memory_space<vmem>>, vector<256x128xbf16>
    %c800 = arith.constant 800 : index
    %c0_10 = arith.constant 0 : index
    %20 = vector.load %arg2[%c800, %c0_10] : memref<1104x384xbf16, #tpu.memory_space<vmem>>, vector<1x128xbf16>
    %21 = arith.extf %20 : vector<1x128xbf16> to vector<1x128xf32>
    %22 = arith.truncf %18 : vector<8x256xf32> to vector<8x256xbf16>
    %cst_11 = arith.constant dense<0.000000e+00> : vector<8x128xf32>
    %23 = tpu.matmul %22, %19, %cst_11 {dimension_numbers = #tpu.dot_dimension_numbers<[1], [0], [0], [1], [0, 0, 1, 1], [], []>} : vector<8x256xbf16>, vector<256x128xbf16>, vector<8x128xf32> -> vector<8x128xf32>
    %24 = vector.broadcast %21 : vector<1x128xf32> to vector<8x128xf32>
    %25 = arith.addf %23, %24 : vector<8x128xf32>
    %cst_12 = arith.constant 0.000000e+00 : f32
    %26 = vector.broadcast %cst_12 : f32 to vector<8x128xf32>
    %27 = arith.maximumf %25, %26 : vector<8x128xf32>
    %c816 = arith.constant 816 : index
    %c0_13 = arith.constant 0 : index
    %28 = vector.load %arg2[%c816, %c0_13] : memref<1104x384xbf16, #tpu.memory_space<vmem>>, vector<128x128xbf16>
    %c944 = arith.constant 944 : index
    %c0_14 = arith.constant 0 : index
    %29 = vector.load %arg2[%c944, %c0_14] : memref<1104x384xbf16, #tpu.memory_space<vmem>>, vector<1x128xbf16>
    %30 = arith.extf %29 : vector<1x128xbf16> to vector<1x128xf32>
    %31 = arith.truncf %27 : vector<8x128xf32> to vector<8x128xbf16>
    %cst_15 = arith.constant dense<0.000000e+00> : vector<8x128xf32>
    %32 = tpu.matmul %31, %28, %cst_15 {dimension_numbers = #tpu.dot_dimension_numbers<[1], [0], [0], [1], [0, 0, 1, 1], [], []>} : vector<8x128xbf16>, vector<128x128xbf16>, vector<8x128xf32> -> vector<8x128xf32>
    %33 = vector.broadcast %30 : vector<1x128xf32> to vector<8x128xf32>
    %34 = arith.addf %32, %33 : vector<8x128xf32>
    %cst_16 = arith.constant 0.000000e+00 : f32
    %35 = vector.broadcast %cst_16 : f32 to vector<8x128xf32>
    %36 = arith.maximumf %34, %35 : vector<8x128xf32>
    %c960 = arith.constant 960 : index
    %c0_17 = arith.constant 0 : index
    %37 = vector.load %arg2[%c960, %c0_17] : memref<1104x384xbf16, #tpu.memory_space<vmem>>, vector<128x128xbf16>
    %c1088 = arith.constant 1088 : index
    %c0_18 = arith.constant 0 : index
    %38 = vector.load %arg2[%c1088, %c0_18] : memref<1104x384xbf16, #tpu.memory_space<vmem>>, vector<1x128xbf16>
    %39 = arith.extf %38 : vector<1x128xbf16> to vector<1x128xf32>
    %40 = arith.truncf %36 : vector<8x128xf32> to vector<8x128xbf16>
    %cst_19 = arith.constant dense<0.000000e+00> : vector<8x128xf32>
    %41 = tpu.matmul %40, %37, %cst_19 {dimension_numbers = #tpu.dot_dimension_numbers<[1], [0], [0], [1], [0, 0, 1, 1], [], []>} : vector<8x128xbf16>, vector<128x128xbf16>, vector<8x128xf32> -> vector<8x128xf32>
    %42 = vector.broadcast %39 : vector<1x128xf32> to vector<8x128xf32>
    %43 = arith.addf %41, %42 : vector<8x128xf32>
    %44 = math.tanh %43 : vector<8x128xf32>
    %c0_20 = arith.constant 0 : index
    %c0_21 = arith.constant 0 : index
    %45 = vector.load %arg3[%c0_20, %c0_21] : memref<8x128xf32, #tpu.memory_space<vmem>>, vector<8x128xf32>
    tpu.vector_store %arg3[%c0_20, %c0_21], %44 {strides = array<i32>} : memref<8x128xf32, #tpu.memory_space<vmem>>, vector<8x128xf32>,
    return
  }
  func.func @transform_0(%arg0: i32) -> (i32, i32) {
    %c0_i32 = arith.constant 0 : i32
    %c0_i32_0 = arith.constant 0 : i32
    return %arg0, %c0_i32 : i32, i32
  }
  func.func @transform_1(%arg0: i32) -> (i32, i32) {
    %c0_i32 = arith.constant 0 : i32
    %c0_i32_0 = arith.constant 0 : i32
    %c0_i32_1 = arith.constant 0 : i32
    return %c0_i32, %c0_i32_0 : i32, i32
  }
  func.func @transform_2(%arg0: i32) -> (i32, i32) {
    %c0_i32 = arith.constant 0 : i32
    %c0_i32_0 = arith.constant 0 : i32
    return %arg0, %c0_i32 : i32, i32
  }
}

</mosaic_0001>

<bundles_post_ra>
// kernel: tpu_custom_call.1
= control target key start
LH: loop header
LB: loop body
LE: loop exit
PB: predicated region body
PF: predicated region fallthrough
CT: control target
= control target key end

     0   :  { %7 = vsyncpa [#allocation3], 0  ;;  %s1605_s0 = inlined_call_operand.hbm [shape: f32[8,128], index: 0, kind: input, shape index: {}]   ;;  %s1606_s1 = inlined_call_operand.hbm [shape: bf16[1104,384], index: 1, kind: input, shape index: {}]   ;;  %s1607_s2 = inlined_call_operand.hbm [shape: f32[8,128], index: 2, kind: output, shape index: {}]  }
   0x1   :  { %8 = vsyncpa [#allocation6], 0 }
   0x2   :  { %9 = vsyncpa [#allocation4], 0  ;;  %s1531_s9 = smov [#allocation2]   ;;  %s1532_s11 = smov [#allocation5]  }
   0x3   :  { %s16_s10 = sshll.u32 %s1531_s9, 4  ;;  %s25_s12 = sshll.u32 %s1532_s11, 4  ;;  %s17_s10 = int_to_ptr.vmem [resolvable:$true] %s16_s10  ;;  %s26_s12 = int_to_ptr.vmem [resolvable:$true] %s25_s12 }
   0x4   :  { %s1473_s13 = scalar_lea.vmem %s17_s10, 128  ;;  %p1478_p1 = scmp.lt.s32.totalorder %s17_s10, %s17_s10 }
   0x5   :  { %p1474_p0 = scmp.ne.s32.totalorder %s17_s10, %s1473_s13  ;;  %p1479_p2 = scmp.lt.s32.totalorder %s1473_s13, %s1473_s13 }
   0x7   :  { %p1480_p3 = por %p1479_p2, %p1478_p1 }
   0x9   :  { %p1481_p4 = pnand %p1480_p3, %p1474_p0 }
   0xb   :  { %1484 = shalt.err (!%p1481_p4)
}
   0xc   :  { %19 = dma.hbm_to_vmem [thread:$0]  %s1605_s0, 128, %s17_s10, [#allocation3]  }
   0xd   :  { %s1493_s16 = scalar_lea.vmem %s26_s12, 26496  ;;  %p1498_p6 = scmp.lt.s32.totalorder %s26_s12, %s26_s12 }
   0xe   :  { %p1494_p5 = scmp.ne.s32.totalorder %s26_s12, %s1493_s16  ;;  %p1499_p7 = scmp.lt.s32.totalorder %s1493_s16, %s1493_s16 }
  0x10   :  { %p1500_p8 = por %p1499_p7, %p1498_p6 }
  0x12   :  { %p1501_p9 = pnand %p1500_p8, %p1494_p5 }
  0x14   :  { %1504 = shalt.err (!%p1501_p9)
}
  0x15   :  { %s1533_s17 = smov 192   ;;  %s1534_s18 = smov 12  }
  0x16   :  { %31 = dma.hbm_to_vmem [thread:$0]  %s1606_s1, 26496, %s26_s12, [#allocation6], %s1533_s17, %s1533_s17, %s1534_s18  }
  0x17   :  { %1525 = dma.done.wait [#allocation3], 128  }
  0x18   :  { %1526 = vsyncadd [#allocation3], 4294967168 }
  0x19   :  { %1527 = dma.done.wait [#allocation6], 26496  }
  0x1a   :  { %1528 = vsyncadd [#allocation6], 4294940800  ;;  %v1535_v0 = vmov 0.0   ;;  %vm1536_vm0 = vmmov 0   ;;  %v1537_v1 = vmov 0   ;;  %v39_v25 = vld [vmem:[#allocation2] sm:$0xff] }
  0x1b   :  { %1259 = vmatprep.subr.bf16.mxu1 %v1535_v0  ;;  %1275 = vmatprep.mubr.msk.bf16.mxu1 %vm1536_vm0, %v1535_v0  ;;  %v1327_v2 = vld [vmem:[#allocation5 + $0xac] ss:$12 sps:$4 sm:$0xff]   ;;  %v1329_v3 = vld [vmem:[#allocation5 + $0xb0] ss:$12 sps:$4 sm:$0xff]   ;;  %v1330_v4 = vld [vmem:[#allocation5 + $0xa8] ss:$12 sps:$4 sm:$0xff]   ;;  %v77_v28 = vpack.c.bf16 %v39_v25, %v39_v25 }
  0x1c   :  { %250 = vmatprep.mubr.bf16.mxu0 %v1537_v1  ;;  %218 = vmatprep.subr.bf16.mxu0 %v1327_v2  ;;  %v1331_v5 = vld [vmem:[#allocation5 + $0x94] ss:$12 sps:$4 sm:$0xff]   ;;  %v1333_v6 = vld [vmem:[#allocation5 + $0x98] ss:$12 sps:$4 sm:$0xff]   ;;  %v1334_v7 = vld [vmem:[#allocation5 + $0x90] ss:$12 sps:$4 sm:$0xff]  }
  0x1d   :  { %1260 = vmatpush3.bf16.msra.mxu1 %v1329_v3  ;;  %219 = vmatpush1.bf16.msra.mxu0 %v1330_v4  ;;  %v1335_v8 = vld [vmem:[#allocation5 + $0x7c] ss:$12 sps:$4 sm:$0xff]   ;;  %v1337_v9 = vld [vmem:[#allocation5 + $0x80] ss:$12 sps:$4 sm:$0xff]   ;;  %v1338_v10 = vld [vmem:[#allocation5 + $0x78] ss:$12 sps:$4 sm:$0xff]  }
  0x1e   :  { %1261 = vmatprep.subr.bf16.mxu1 %v1535_v0  ;;  %220 = vmatprep.subr.bf16.mxu0 %v1331_v5  ;;  %v1339_v11 = vld [vmem:[#allocation5 + $0x64] ss:$12 sps:$4 sm:$0xff]   ;;  %v1341_v12 = vld [vmem:[#allocation5 + $0x68] ss:$12 sps:$4 sm:$0xff]   ;;  %v1342_v13 = vld [vmem:[#allocation5 + $0x60] ss:$12 sps:$4 sm:$0xff]  }
  0x1f   :  { %v1343_v14 = vld [vmem:[#allocation5 + $0x4c] ss:$12 sps:$4 sm:$0xff]   ;;  %v1345_v15 = vld [vmem:[#allocation5 + $0x50] ss:$12 sps:$4 sm:$0xff]   ;;  %v1346_v16 = vld [vmem:[#allocation5 + $0x48] ss:$12 sps:$4 sm:$0xff]  }
  0x20   :  { %v1347_v17 = vld [vmem:[#allocation5 + $0x34] ss:$12 sps:$4 sm:$0xff]   ;;  %v1349_v18 = vld [vmem:[#allocation5 + $0x38] ss:$12 sps:$4 sm:$0xff]   ;;  %v1350_v19 = vld [vmem:[#allocation5 + $0x30] ss:$12 sps:$4 sm:$0xff]  }
  0x21   :  { %1262 = vmatpush3.bf16.msra.mxu1 %v1333_v6  ;;  %221 = vmatpush1.bf16.msra.mxu0 %v1334_v7  ;;  %v1351_v20 = vld [vmem:[#allocation5 + $0x1c] ss:$12 sps:$4 sm:$0xff]   ;;  %v1353_v21 = vld [vmem:[#allocation5 + $0x20] ss:$12 sps:$4 sm:$0xff]   ;;  %v1354_v22 = vld [vmem:[#allocation5 + $0x18] ss:$12 sps:$4 sm:$0xff]  }
  0x22   :  { %1263 = vmatprep.subr.bf16.mxu1 %v1535_v0  ;;  %222 = vmatprep.subr.bf16.mxu0 %v1335_v8  ;;  %v1355_v23 = vld [vmem:[#allocation5 + $0x4] ss:$12 sps:$4 sm:$0xff]   ;;  %v1357_v24 = vld [vmem:[#allocation5 + $0x8] ss:$12 sps:$4 sm:$0xff]   ;;  %v1358_v26 = vld [vmem:[#allocation5] ss:$12 sps:$4 sm:$0xff]  }
  0x23   :  { %v1361_v27 = vld [vmem:[#allocation5 + $0x184] ss:$12 sps:$4 sm:$0xff]   ;;  %v1383_v30 = vld [vmem:[#allocation5 + $0x300] ss:$12 sps:$4 sm:$0xff]   ;;  %v1362_v34 = vld [vmem:[#allocation5 + $0x168] ss:$12 sps:$4 sm:$0xff]  }
  0x24   :  { %v1385_v29 = vld [vmem:[#allocation5 + $0x304] ss:$12 sps:$4 sm:$0xff]   ;;  %v1359_v31 = vld [vmem:[#allocation5 + $0x180] ss:$12 sps:$4 sm:$0xff]   ;;  %v1389_v35 = vld [vmem:[#allocation5 + $0x2e8] ss:$12 sps:$4 sm:$0xff]  }
  0x25   :  { %1264 = vmatpush3.bf16.msra.mxu1 %v1337_v9  ;;  %223 = vmatpush1.bf16.msra.mxu0 %v1338_v10  ;;  %v1364_v32 = vld [vmem:[#allocation5 + $0x16c] ss:$12 sps:$4 sm:$0xff]   ;;  %v1397_v36 = vld [vmem:[#allocation5 + $0x2d4] ss:$12 sps:$4 sm:$0xff]   ;;  %v1365_v38 = vld [vmem:[#allocation5 + $0x150] ss:$12 sps:$4 sm:$0xff]  }
  0x26   :  { %1265 = vmatprep.subr.bf16.mxu1 %v1535_v0  ;;  %224 = vmatprep.subr.bf16.mxu0 %v1339_v11  ;;  %v1391_v33 = vld [vmem:[#allocation5 + $0x2ec] ss:$12 sps:$4 sm:$0xff]   ;;  %v1367_v37 = vld [vmem:[#allocation5 + $0x154] ss:$12 sps:$4 sm:$0xff]   ;;  %v1395_v39 = vld [vmem:[#allocation5 + $0x2d0] ss:$12 sps:$4 sm:$0xff]  }
  0x27   :  { %v1403_v40 = vld [vmem:[#allocation5 + $0x2bc] ss:$12 sps:$4 sm:$0xff]   ;;  %v1368_v42 = vld [vmem:[#allocation5 + $0x138] ss:$12 sps:$4 sm:$0xff]   ;;  %v1371_v46 = vld [vmem:[#allocation5 + $0x120] ss:$12 sps:$4 sm:$0xff]  }
  0x28   :  { %v1370_v41 = vld [vmem:[#allocation5 + $0x13c] ss:$12 sps:$4 sm:$0xff]   ;;  %v1401_v43 = vld [vmem:[#allocation5 + $0x2b8] ss:$12 sps:$4 sm:$0xff]   ;;  %v1407_v47 = vld [vmem:[#allocation5 + $0x2a0] ss:$12 sps:$4 sm:$0xff]  }
  0x29   :  { %1266 = vmatpush3.bf16.msra.mxu1 %v1341_v12  ;;  %225 = vmatpush1.bf16.msra.mxu0 %v1342_v13  ;;  %v1409_v44 = vld [vmem:[#allocation5 + $0x2a4] ss:$12 sps:$4 sm:$0xff]   ;;  %v1376_v48 = vld [vmem:[#allocation5 + $0x10c] ss:$12 sps:$4 sm:$0xff]   ;;  %v1413_v50 = vld [vmem:[#allocation5 + $0x288] ss:$12 sps:$4 sm:$0xff]  }
  0x2a   :  { %1267 = vmatprep.subr.bf16.mxu1 %v1535_v0  ;;  %226 = vmatprep.subr.bf16.mxu0 %v1343_v14  ;;  %v1373_v45 = vld [vmem:[#allocation5 + $0x124] ss:$12 sps:$4 sm:$0xff]   ;;  %v1415_v49 = vld [vmem:[#allocation5 + $0x28c] ss:$12 sps:$4 sm:$0xff]   ;;  %v1374_v51 = vld [vmem:[#allocation5 + $0x108] ss:$12 sps:$4 sm:$0xff]   ;;  %v78_v14 = vlaneseq }
  0x2b   :  { %v1421_v52 = vld [vmem:[#allocation5 + $0x274] ss:$12 sps:$4 sm:$0xff]   ;;  %v1419_v54 = vld [vmem:[#allocation5 + $0x270] ss:$12 sps:$4 sm:$0xff]   ;;  %v1380_v57 = vld [vmem:[#allocation5 + $0xd8] ss:$12 sps:$4 sm:$0xff]  }
  0x2c   :  { %v1379_v53 = vld [vmem:[#allocation5 + $0xf4] ss:$12 sps:$4 sm:$0xff]   ;;  %v1377_v55 = vld [vmem:[#allocation5 + $0xf0] ss:$12 sps:$4 sm:$0xff]   ;;  %v1394_v60 = vld [vmem:[#allocation5 + $0x22c] ss:$12 sps:$4 sm:$0xff]  }
  0x2d   :  { %1268 = vmatpush3.bf16.msra.mxu1 %v1345_v15  ;;  %227 = vmatpush1.bf16.msra.mxu0 %v1346_v16  ;;  %v1382_v56 = vld [vmem:[#allocation5 + $0xdc] ss:$12 sps:$4 sm:$0xff]   ;;  %v1388_v58 = vld [vmem:[#allocation5 + $0x244] ss:$12 sps:$4 sm:$0xff]   ;;  %v1386_v59 = vld [vmem:[#allocation5 + $0x240] ss:$12 sps:$4 sm:$0xff]  }
  0x2e   :  { %1269 = vmatprep.subr.bf16.mxu1 %v1535_v0  ;;  %228 = vmatprep.subr.bf16.mxu0 %v1347_v17  ;;  %v1392_v61 = vld [vmem:[#allocation5 + $0x228] ss:$12 sps:$4 sm:$0xff]   ;;  %v1398_v63 = vld [vmem:[#allocation5 + $0x210] ss:$12 sps:$4 sm:$0xff]   ;;  %v1404_v2 = vld [vmem:[#allocation5 + $0x1f8] ss:$12 sps:$4 sm:$0xff]  }
  0x2f   :  { %v1400_v62 = vld [vmem:[#allocation5 + $0x214] ss:$12 sps:$4 sm:$0xff]   ;;  %v1412_v3 = vld [vmem:[#allocation5 + $0x1e4] ss:$12 sps:$4 sm:$0xff]   ;;  %v1418_v5 = vld [vmem:[#allocation5 + $0x1cc] ss:$12 sps:$4 sm:$0xff]  }
  0x30   :  { %v1410_v4 = vld [vmem:[#allocation5 + $0x1e0] ss:$12 sps:$4 sm:$0xff]   ;;  %v1416_v6 = vld [vmem:[#allocation5 + $0x1c8] ss:$12 sps:$4 sm:$0xff]   ;;  %v1422_v9 = vld [vmem:[#allocation5 + $0x1b0] ss:$12 sps:$4 sm:$0xff]  }
  0x31   :  { %1270 = vmatpush3.bf16.msra.mxu1 %v1349_v18  ;;  %229 = vmatpush1.bf16.msra.mxu0 %v1350_v19  ;;  %v1424_v7 = vld [vmem:[#allocation5 + $0x1b4] ss:$12 sps:$4 sm:$0xff]   ;;  %v1427_v8 = vld [vmem:[#allocation5 + $0x25c] ss:$12 sps:$4 sm:$0xff]   ;;  %v1425_v10 = vld [vmem:[#allocation5 + $0x258] ss:$12 sps:$4 sm:$0xff]  }
  0x32   :  { %1271 = vmatprep.subr.bf16.mxu1 %v1535_v0  ;;  %230 = vmatprep.subr.bf16.mxu0 %v1351_v20  ;;  %v1430_v11 = vld [vmem:[#allocation5 + $0x19c] ss:$12 sps:$4 sm:$0xff]   ;;  %v1428_v12 = vld [vmem:[#allocation5 + $0x198] ss:$12 sps:$4 sm:$0xff]   ;;  %v79_v15 = vshrl.u32 %v78_v14, 7  ;;  %s1538_s0 = smov [#allocation7]  }
  0x33   :  { %v1431_v13 = vld [vmem:[#allocation5 + $0x498] ss:$12 sps:$4 sm:$0xff]   ;;  %v73_v16 = vld [vmem:[#allocation5 + $0xc8] sm:$0x1]  ;;  %s1096_s1 = sshll.u32 %s1538_s0, 4  ;;  %s1097_s1 = int_to_ptr.vmem [resolvable:$true] %s1096_s1 }
  0x34   :  { %v72_v17 = vld [vmem:[#allocation5 + $0xc0] sm:$0x11]  ;;  %v76_v18 = vunpack.c.l.bf16 %v73_v16  ;;  %v1573_v19 = vsub.s32 0, %v79_v15  ;;  %s1505_s21 = scalar_lea.vmem %s1097_s1, 128  ;;  %p1510_p11 = scmp.lt.s32.totalorder %s1097_s1, %s1097_s1 }
  0x35   :  { %1272 = vmatpush3.bf16.msra.mxu1 %v1353_v21  ;;  %231 = vmatpush1.bf16.msra.mxu0 %v1354_v22  ;;  %v74_v20 = vunpack.c.l.bf16 %v72_v17  ;;  %v75_v21 = vunpack.c.h.bf16 %v72_v17  ;;  %p1506_p10 = scmp.ne.s32.totalorder %s1097_s1, %s1505_s21  ;;  %p1511_p12 = scmp.lt.s32.totalorder %s1505_s21, %s1505_s21 }
  0x36   :  { %1273 = vmatprep.subr.bf16.mxu1 %v1535_v0  ;;  %232 = vmatprep.subr.bf16.mxu0 %v1355_v23  ;;  %v89_v22 = vrot.slane %v76_v18, %v1573_v19 }
  0x37   :  { %v81_v23 = vrot.slane %v74_v20, %v1573_v19  ;;  %v85_v25 = vrot.slane %v75_v21, %v1573_v19  ;;  %v1452_v21 = vld [vmem:[#allocation5 + $0x4f8] ss:$12 sps:$4 sm:$0xff]   ;;  %p1512_p13 = por %p1511_p12, %p1510_p11 }
  0x39   :  { %1274 = vmatpush3.bf16.msra.mxu1 %v1357_v24  ;;  %233 = vmatpush1.bf16.msra.mxu0 %v1358_v26  ;;  %p1513_p0 = pnand %p1512_p13, %p1506_p10 }
  0x3a   :  { %645 = vmatprep.subr.bf16.mxu1 %v1385_v29  ;;  %604 = vmatprep.subr.bf16.mxu0 %v1361_v27 }
  0x3c   :  { %1276 = vmatmul.mubr.bf16.vlgmr.msra.gmra.mxu1 %v77_v28  ;;  %251 = vmatmul.mubr.bf16.vlgmr.msra.gmra.mxu0 %v77_v28 }
  0x3d   :  { %646 = vmatpush1.bf16.msra.mxu1 %v1383_v30  ;;  %605 = vmatpush1.bf16.msra.mxu0 %v1359_v31 }
  0x3e   :  { %647 = vmatprep.subr.bf16.mxu1 %v1391_v33  ;;  %606 = vmatprep.subr.bf16.mxu0 %v1364_v32 }
  0x3f   :  { %677 = vmatprep.mubr.bf16.mxu1 %v1537_v1  ;;  %v1406_v1 = vld [vmem:[#allocation5 + $0x1fc] ss:$12 sps:$4 sm:$0xff]  }
  0x41   :  { %648 = vmatpush1.bf16.msra.mxu1 %v1389_v35  ;;  %607 = vmatpush1.bf16.msra.mxu0 %v1362_v34  ;;  %v1432_v34 = vld [vmem:[#allocation5 + $0x3d8] ss:$12 sps:$4 sm:$0xff]  }
  0x42   :  { %649 = vmatprep.subr.bf16.mxu1 %v1397_v36  ;;  %608 = vmatprep.subr.bf16.mxu0 %v1367_v37 }
  0x45   :  { %650 = vmatpush1.bf16.msra.mxu1 %v1395_v39  ;;  %609 = vmatpush1.bf16.msra.mxu0 %v1365_v38  ;;  %v1433_v38 = vld [vmem:[#allocation5 + $0x480] ss:$12 sps:$4 sm:$0xff]  }
  0x46   :  { %651 = vmatprep.subr.bf16.mxu1 %v1403_v40  ;;  %610 = vmatprep.subr.bf16.mxu0 %v1370_v41 }
  0x49   :  { %652 = vmatpush1.bf16.msra.mxu1 %v1401_v43  ;;  %611 = vmatpush1.bf16.msra.mxu0 %v1368_v42  ;;  %v1434_v43 = vld [vmem:[#allocation5 + $0x3c0] ss:$12 sps:$4 sm:$0xff]  }
  0x4a   :  { %653 = vmatprep.subr.bf16.mxu1 %v1409_v44  ;;  %612 = vmatprep.subr.bf16.mxu0 %v1373_v45  ;;  %v1435_v45 = vld [vmem:[#allocation5 + $0x468] ss:$12 sps:$4 sm:$0xff]  }
  0x4d   :  { %654 = vmatpush1.bf16.msra.mxu1 %v1407_v47  ;;  %613 = vmatpush1.bf16.msra.mxu0 %v1371_v46  ;;  %v1436_v46 = vld [vmem:[#allocation5 + $0x3a8] ss:$12 sps:$4 sm:$0xff]   ;;  %v1437_v47 = vld [vmem:[#allocation5 + $0x450] ss:$12 sps:$4 sm:$0xff]  }
  0x4e   :  { %655 = vmatprep.subr.bf16.mxu1 %v1415_v49  ;;  %614 = vmatprep.subr.bf16.mxu0 %v1376_v48  ;;  %v1438_v48 = vld [vmem:[#allocation5 + $0x390] ss:$12 sps:$4 sm:$0xff]   ;;  %v1439_v49 = vld [vmem:[#allocation5 + $0x438] ss:$12 sps:$4 sm:$0xff]  }
  0x51   :  { %656 = vmatpush1.bf16.msra.mxu1 %v1413_v50  ;;  %615 = vmatpush1.bf16.msra.mxu0 %v1374_v51  ;;  %v1440_v50 = vld [vmem:[#allocation5 + $0x378] ss:$12 sps:$4 sm:$0xff]   ;;  %v1441_v51 = vld [vmem:[#allocation5 + $0x420] ss:$12 sps:$4 sm:$0xff]  }
  0x52   :  { %657 = vmatprep.subr.bf16.mxu1 %v1421_v52  ;;  %616 = vmatprep.subr.bf16.mxu0 %v1379_v53  ;;  %v1442_v52 = vld [vmem:[#allocation5 + $0x360] ss:$12 sps:$4 sm:$0xff]   ;;  %v1443_v53 = vld [vmem:[#allocation5 + $0x408] ss:$12 sps:$4 sm:$0xff]  }
  0x55   :  { %658 = vmatpush1.bf16.msra.mxu1 %v1419_v54  ;;  %617 = vmatpush1.bf16.msra.mxu0 %v1377_v55  ;;  %v1444_v54 = vld [vmem:[#allocation5 + $0x348] ss:$12 sps:$4 sm:$0xff]   ;;  %v1445_v55 = vld [vmem:[#allocation5 + $0x3f0] ss:$12 sps:$4 sm:$0xff]  }
  0x56   :  { %618 = vmatprep.subr.bf16.mxu0 %v1382_v56  ;;  %659 = vmatprep.subr.bf16.mxu1 %v1427_v8  ;;  %v1446_v56 = vld [vmem:[#allocation5 + $0x330] ss:$12 sps:$4 sm:$0xff]  }
  0x59   :  { %619 = vmatpush1.bf16.msra.mxu0 %v1380_v57  ;;  %660 = vmatpush1.bf16.msra.mxu1 %v1425_v10  ;;  %v1447_v57 = vld [vmem:[#allocation5 + $0x570] ss:$12 sps:$4 sm:$0xff]  }
  0x5a   :  { %620 = vmatprep.subr.bf16.mxu0 %v1388_v58  ;;  %1219 = vmatprep.subr.bf16.mxu1 %v1431_v13  ;;  %v1448_v58 = vld [vmem:[#allocation5 + $0x558] ss:$12 sps:$4 sm:$0xff]  }
  0x5d   :  { %621 = vmatpush2.bf16.msra.mxu0 %v1386_v59  ;;  %v1449_v59 = vld [vmem:[#allocation5 + $0x540] ss:$12 sps:$4 sm:$0xff]  }
  0x5e   :  { %622 = vmatprep.subr.bf16.mxu0 %v1394_v60  ;;  %v1450_v60 = vld [vmem:[#allocation5 + $0x528] ss:$12 sps:$4 sm:$0xff]  }
  0x61   :  { %623 = vmatpush2.bf16.msra.mxu0 %v1392_v61  ;;  %v1451_v61 = vld [vmem:[#allocation5 + $0x510] ss:$12 sps:$4 sm:$0xff]  }
  0x62   :  { %624 = vmatprep.subr.bf16.mxu0 %v1400_v62  ;;  %v350_v62 = vld [vmem:[#allocation5 + $0x318] sm:$0x11] }
  0x65   :  { %625 = vmatpush2.bf16.msra.mxu0 %v1398_v63  ;;  %v351_v63 = vunpack.c.l.bf16 %v350_v62 }
  0x66   :  { %626 = vmatprep.subr.bf16.mxu0 %v1406_v1  ;;  %v352_v1 = vunpack.c.h.bf16 %v350_v62 }
  0x69   :  { %627 = vmatpush2.bf16.msra.mxu0 %v1404_v2 }
  0x6a   :  { %628 = vmatprep.subr.bf16.mxu0 %v1412_v3  ;;  %v359_v3 = vrot.slane %v351_v63, %v1573_v19 }
  0x6d   :  { %629 = vmatpush2.bf16.msra.mxu0 %v1410_v4 }
  0x6e   :  { %630 = vmatprep.subr.bf16.mxu0 %v1418_v5  ;;  %v363_v5 = vrot.slane %v352_v1, %v1573_v19 }
  0x71   :  { %631 = vmatpush2.bf16.msra.mxu0 %v1416_v6 }
  0x72   :  { %632 = vmatprep.subr.bf16.mxu0 %v1424_v7 }
  0x75   :  { %633 = vmatpush2.bf16.msra.mxu0 %v1422_v9 }
  0x76   :  { %634 = vmatprep.subr.bf16.mxu0 %v1430_v11 }
  0x79   :  { %635 = vmatpush2.bf16.msra.mxu0 %v1428_v12 }
  0x7a   :  { %1279 = vmatprep.subr.bf16.mxu0 %v1535_v0 }
  0xfc   :  { %v293_v24 = vpop.f32.mrf.mxu1  ;;  %v252_v27 = vpop.f32.mrf.mxu0 }
  0xfd   :  { %v294_v26 = vadd.f32 %v293_v24, %v89_v22  ;;  %v253_v28 = vadd.f32 %v252_v27, %v81_v23  ;;  %v1453_v22 = vld [vmem:[#allocation5 + $0x4e0] ss:$12 sps:$4 sm:$0xff]   ;;  %v1454_v23 = vld [vmem:[#allocation5 + $0x4c8] ss:$12 sps:$4 sm:$0xff]  }
  0xfe   :  { %v1277_v29 = vpop.f32.mrf.mxu1  ;;  %v254_v31 = vpop.f32.mrf.mxu0  ;;  %v1455_v24 = vld [vmem:[#allocation5 + $0x648] ss:$12 sps:$4 sm:$0xff]   ;;  %v1458_v27 = vld [vmem:[#allocation5 + $0x600] ss:$12 sps:$4 sm:$0xff]  }
  0xff   :  { %v301_v30 = vmax.f32 %v294_v26, 0.0  ;;  %v255_v32 = vadd.f32 %v254_v31, %v85_v25  ;;  %v299_v36 = vmax.f32 %v253_v28, 0.0  ;;  %v1456_v25 = vld [vmem:[#allocation5 + $0x630] ss:$12 sps:$4 sm:$0xff]   ;;  %v1457_v26 = vld [vmem:[#allocation5 + $0x618] ss:$12 sps:$4 sm:$0xff]  }
 0x100   :  { %v296_v33 = vpop.f32.mrf.mxu1  ;;  %v256_v37 = vpop.f32.mrf.mxu0  ;;  %v1459_v28 = vld [vmem:[#allocation5 + $0x5e8] ss:$12 sps:$4 sm:$0xff]   ;;  %v1460_v29 = vld [vmem:[#allocation5 + $0x5d0] ss:$12 sps:$4 sm:$0xff]  }
 0x101   :  { %v355_v35 = vpack.c.bf16 %v301_v30, %v301_v30  ;;  %v300_v39 = vmax.f32 %v255_v32, 0.0  ;;  %v353_v44 = vpack.c.bf16 %v299_v36, %v299_v36  ;;  %v720_v30 = vld [vmem:[#allocation5 + $0x4b0] sm:$0x1] }
 0x102   :  { %v1278_v40 = vpop.f32.mrf.mxu1  ;;  %v257_v41 = vpop.f32.mrf.mxu0  ;;  %v721_v31 = vunpack.c.l.bf16 %v720_v30 }
 0x103   :  { %678 = vmatmul.mubr.bf16.vlgmr.msra.gmra.mxu1 %v355_v35  ;;  %v354_v42 = vpack.c.bf16 %v300_v39, %v300_v39  ;;  %v1461_v41 = vld [vmem:[#allocation5 + $0x5b8] ss:$12 sps:$4 sm:$0xff]  }
 0x104   :  { %1220 = vmatpush3.bf16.msra.mxu1 %v1432_v34  ;;  %v727_v33 = vrot.slane %v721_v31, %v1573_v19 }
 0x105   :  { %1221 = vmatprep.subr.bf16.mxu1 %v1433_v38  ;;  %636 = vmatprep.mubr.bf16.mxu0 %v354_v42  ;;  %v1462_v42 = vld [vmem:[#allocation5 + $0x5a0] ss:$12 sps:$4 sm:$0xff]  }
 0x106   :  { %637 = vmatmul.mubr.bf16.vlgmr.msra.gmra.mxu0 %v353_v44 }
 0x107   :  { %1295 = vmatprep.mubr.msk.bf16.mxu0 %vm1536_vm0, %v1535_v0  ;;  %1280 = vmatpush3.bf16.msra.mxu0 %v1447_v57 }
 0x108   :  { %1222 = vmatpush3.bf16.msra.mxu1 %v1434_v43  ;;  %1281 = vmatprep.subr.bf16.mxu0 %v1535_v0  ;;  %v881_v43 = vld [vmem:[#allocation5 + $0x588] sm:$0x1] }
 0x109   :  { %1223 = vmatprep.subr.bf16.mxu1 %v1435_v45  ;;  %v882_v44 = vunpack.c.l.bf16 %v881_v43 }
 0x10b   :  { %1282 = vmatpush3.bf16.msra.mxu0 %v1448_v58  ;;  %v887_v45 = vrot.slane %v882_v44, %v1573_v19 }
 0x10c   :  { %1224 = vmatpush3.bf16.msra.mxu1 %v1436_v46  ;;  %1283 = vmatprep.subr.bf16.mxu0 %v1535_v0 }
 0x10d   :  { %1225 = vmatprep.subr.bf16.mxu1 %v1437_v47 }
 0x10f   :  { %1284 = vmatpush3.bf16.msra.mxu0 %v1449_v59 }
 0x110   :  { %1226 = vmatpush3.bf16.msra.mxu1 %v1438_v48  ;;  %1285 = vmatprep.subr.bf16.mxu0 %v1535_v0 }
 0x111   :  { %1227 = vmatprep.subr.bf16.mxu1 %v1439_v49 }
 0x113   :  { %1286 = vmatpush3.bf16.msra.mxu0 %v1450_v60 }
 0x114   :  { %1228 = vmatpush3.bf16.msra.mxu1 %v1440_v50  ;;  %1287 = vmatprep.subr.bf16.mxu0 %v1535_v0 }
 0x115   :  { %1229 = vmatprep.subr.bf16.mxu1 %v1441_v51 }
 0x117   :  { %1288 = vmatpush3.bf16.msra.mxu0 %v1451_v61 }
 0x118   :  { %1230 = vmatpush3.bf16.msra.mxu1 %v1442_v52  ;;  %1289 = vmatprep.subr.bf16.mxu0 %v1535_v0 }
 0x119   :  { %1231 = vmatprep.subr.bf16.mxu1 %v1443_v53  ;;  %v993_v53 = vld [vmem:[#allocation5 + $0x660] sm:$0x1] }
 0x11b   :  { %1290 = vmatpush3.bf16.msra.mxu0 %v1452_v21 }
 0x11c   :  { %1232 = vmatpush3.bf16.msra.mxu1 %v1444_v54  ;;  %1291 = vmatprep.subr.bf16.mxu0 %v1535_v0  ;;  %v994_v54 = vunpack.c.l.bf16 %v993_v53 }
 0x11d   :  { %1233 = vmatprep.subr.bf16.mxu1 %v1445_v55 }
 0x11e   :  { %v999_v55 = vrot.slane %v994_v54, %v1573_v19 }
 0x11f   :  { %1292 = vmatpush3.bf16.msra.mxu0 %v1453_v22 }
 0x120   :  { %1234 = vmatpush3.bf16.msra.mxu1 %v1446_v56  ;;  %1293 = vmatprep.subr.bf16.mxu0 %v1535_v0 }
 0x121   :  { %1299 = vmatprep.subr.bf16.mxu1 %v1535_v0 }
 0x123   :  { %1294 = vmatpush3.bf16.msra.mxu0 %v1454_v23 }
 0x1c3   :  { %v679_v2 = vpop.f32.mrf.mxu1 }
 0x1c5   :  { %v681_v4 = vpop.f32.mrf.mxu1 }
 0x1c6   :  { %v638_v6 = vpop.f32.mrf.mxu0 }
 0x1c7   :  { %v683_v7 = vpop.f32.mrf.mxu1  ;;  %v639_v8 = vadd.f32 %v638_v6, %v359_v3 }
 0x1c8   :  { %v640_v9 = vpop.f32.mrf.mxu0 }
 0x1c9   :  { %v684_v10 = vpop.f32.mrf.mxu1  ;;  %v680_v11 = vadd.f32 %v679_v2, %v639_v8  ;;  %v641_v12 = vadd.f32 %v640_v9, %v363_v5 }
 0x1ca   :  { %v642_v13 = vpop.f32.mrf.mxu0 }
 0x1cb   :  { %v682_v14 = vadd.f32 %v681_v4, %v641_v12  ;;  %v686_v15 = vmax.f32 %v680_v11, 0.0 }
 0x1cc   :  { %v643_v16 = vpop.f32.mrf.mxu0 }
 0x1cd   :  { %v687_v17 = vmax.f32 %v682_v14, 0.0  ;;  %v722_v20 = vpack.c.bf16 %v686_v15, %v686_v15 }
 0x1cf   :  { %v723_v18 = vpack.c.bf16 %v687_v17, %v687_v17 }
 0x1d1   :  { %856 = vmatprep.mubr.bf16.mxu1 %v723_v18 }
 0x1d2   :  { %857 = vmatmul.mubr.bf16.vlgmr.msra.gmra.mxu1 %v722_v20 }
 0x1d3   :  { %1315 = vmatprep.mubr.msk.bf16.mxu1 %vm1536_vm0, %v1535_v0  ;;  %1300 = vmatpush3.bf16.msra.mxu1 %v1455_v24 }
 0x1d4   :  { %1301 = vmatprep.subr.bf16.mxu1 %v1535_v0 }
 0x1d7   :  { %1302 = vmatpush3.bf16.msra.mxu1 %v1456_v25 }
 0x1d8   :  { %1303 = vmatprep.subr.bf16.mxu1 %v1535_v0 }
 0x1db   :  { %1304 = vmatpush3.bf16.msra.mxu1 %v1457_v26 }
 0x1dc   :  { %1305 = vmatprep.subr.bf16.mxu1 %v1535_v0 }
 0x1df   :  { %1306 = vmatpush3.bf16.msra.mxu1 %v1458_v27 }
 0x1e0   :  { %1307 = vmatprep.subr.bf16.mxu1 %v1535_v0 }
 0x1e3   :  { %1308 = vmatpush3.bf16.msra.mxu1 %v1459_v28 }
 0x1e4   :  { %1309 = vmatprep.subr.bf16.mxu1 %v1535_v0 }
 0x1e7   :  { %1310 = vmatpush3.bf16.msra.mxu1 %v1460_v29 }
 0x1e8   :  { %1311 = vmatprep.subr.bf16.mxu1 %v1535_v0 }
 0x1eb   :  { %1312 = vmatpush3.bf16.msra.mxu1 %v1461_v41 }
 0x1ec   :  { %1313 = vmatprep.subr.bf16.mxu1 %v1535_v0 }
 0x1ef   :  { %1314 = vmatpush3.bf16.msra.mxu1 %v1462_v42 }
 0x292   :  { %v1235_v32 = vpop.f32.mrf.mxu1 }
 0x294   :  { %v1236_v34 = vpop.f32.mrf.mxu1 }
 0x295   :  { %v1237_v35 = vadd.f32 %v1236_v34, %v1235_v32 }
 0x296   :  { %v1238_v36 = vpop.f32.mrf.mxu1 }
 0x297   :  { %v859_v37 = vadd.f32 %v1237_v35, %v727_v33 }
 0x298   :  { %v1239_v38 = vpop.f32.mrf.mxu1 }
 0x299   :  { %v864_v39 = vmax.f32 %v859_v37, 0.0 }
 0x29b   :  { %v883_v40 = vpack.c.bf16 %v864_v39, %v864_v39 }
 0x29d   :  { %1296 = vmatmul.mubr.bf16.vlgmr.msra.gmra.mxu0 %v883_v40 }
 0x35d   :  { %v970_v46 = vpop.f32.mrf.mxu0 }
 0x35e   :  { %v971_v47 = vadd.f32 %v970_v46, %v887_v45 }
 0x35f   :  { %v1297_v48 = vpop.f32.mrf.mxu0 }
 0x360   :  { %v976_v49 = vmax.f32 %v971_v47, 0.0 }
 0x361   :  { %v973_v50 = vpop.f32.mrf.mxu0 }
 0x362   :  { %v995_v51 = vpack.c.bf16 %v976_v49, %v976_v49 }
 0x363   :  { %v1298_v52 = vpop.f32.mrf.mxu0 }
 0x364   :  { %1316 = vmatmul.mubr.bf16.vlgmr.msra.gmra.mxu1 %v995_v51 }
 0x424   :  { %v1082_v56 = vpop.f32.mrf.mxu1 }
 0x425   :  { %v1083_v0 = vadd.f32 %v1082_v56, %v999_v55 }
 0x426   :  { %v1317_v57 = vpop.f32.mrf.mxu1 }
 0x427   :  { %1463 = vtanh.f32 %v1083_v0 }
 0x428   :  { %v1085_v58 = vpop.f32.mrf.mxu1 }
 0x42a   :  { %v1318_v59 = vpop.f32.mrf.mxu1 }
 0x434   :  { %v1464_v60 = vpop.eup %1463 }
 0x435   :  { %1089 = vst [vmem:[#allocation7] sm:$0xff] %v1464_v60 }
 0x436   :  { %1516 = shalt.err (!%p1513_p0)
}
 0x437   :  { %1099 = dma.vmem_to_hbm [thread:$0]  %s1097_s1, 128, %s1607_s2, [#allocation4]  }
 0x438   :  { %1529 = dma.done.wait [#allocation4], 128  }
 0x439   :  { %1530 = vsyncadd [#allocation4], 4294967168 }
 0x43a   :  { %1103 = vsyncpa [#allocation3], 1 }
 0x43b   :  { %1104 = vsyncpa [#allocation6], 1 }
 0x43c   :  { %1105 = vsyncpa [#allocation4], 1 }

</bundles_post_ra>
